<compile_context>
chip_gen: v5e
topology: v5e:2x2
jax: 0.10.0
libtpu: 0.0.40
codegen_flags: <defaults>
</compile_context>

<pallas_src>
import functools

import jax
import jax.numpy as jnp
from jax.experimental import pallas as pl
from jax.experimental.pallas import tpu as pltpu

LANE = 128
SUBLANE = 8


def _round_up(x, m):
    return ((x + m - 1) // m) * m


# ---------------------------------------------------------------------------
# Fused kernel body.
# inputs : x, A(stacked), W_self(stacked), W_neigh(stacked), b(stacked),
#          pred_W(stacked), pred_b(stacked), src_ids, dst_ids
# outputs: h (node embeddings, bf16), scores (f32)
# scratch: h_buf (resident layer input), out_scr (current layer output)
# ---------------------------------------------------------------------------
def _sage_fused_kernel(x_ref, a_ref, ws_ref, wn_ref, b_ref, pw_ref, pb_ref,
                       si_ref, di_ref, h_out_ref, score_ref,
                       h_buf, out_scr, *, tile_m, d_pad):
    l = pl.program_id(0)           # layer (outer, sequential dependency)
    i = pl.program_id(1)           # dst-row tile (inner, streamed A)
    n_layers = pl.num_programs(0)
    n_tiles = pl.num_programs(1)

    @pl.when((l == 0) & (i == 0))
    def _init():
        # x is zero-padded to [S_pad, F_pad] in the wrapper, so every row of
        # h_buf is finite; zero-padded A rows/cols keep padding inert.
        h_buf[...] = x_ref[...]

    row0 = pl.multiple_of(i * tile_m, tile_m)
    a = a_ref[0]                                          # [tm, S_pad] bf16
    h_all = h_buf[...]                                    # [S_pad, F]  bf16
    h_self = h_buf[pl.ds(row0, tile_m), :]                # [tm, F]     bf16

    # mean aggregation over in-neighbours (MXU, f32 accumulate)
    neigh = jnp.dot(a, h_all, preferred_element_type=jnp.float32)
    # self + neighbour projections, accumulated in f32 (no lane concat)
    out = jnp.dot(h_self, ws_ref[0], preferred_element_type=jnp.float32)
    out = out + jnp.dot(neigh.astype(jnp.bfloat16), wn_ref[0],
                        preferred_element_type=jnp.float32)
    out = out + b_ref[0]

    is_last_layer = l == n_layers - 1
    # eval-mode BatchNorm1d folded into W/b; Dropout is eval identity;
    # no BN/ReLU after the last layer (matches the PyTorch forward).
    out = jnp.where(is_last_layer, out, jnp.maximum(out, 0.0))
    out_bf = out.astype(jnp.bfloat16)

    out_scr[pl.ds(row0, tile_m), :] = out_bf
    h_out_ref[...] = out_bf            # revisited per layer; last layer wins

    last_tile = i == n_tiles - 1

    @pl.when(last_tile & jnp.logical_not(is_last_layer))
    def _advance():
        # feed this layer's output (dst nodes = prefix of next layer's src)
        h_buf[pl.ds(0, d_pad), :] = out_scr[...]

    @pl.when(last_tile & is_last_layer)
    def _predict():
        # fused predictor: one-hot gather on the MXU from the VMEM-resident
        # final h, then Linear-ReLU-Linear-ReLU-Linear over h[src]*h[dst].
        hf = out_scr[...]                                 # [Dpad, F] bf16
        e_pad = si_ref.shape[0]
        cols = jax.lax.broadcasted_iota(jnp.int32, (e_pad, d_pad), 1)
        s_oh = jnp.where(cols == si_ref[...], 1.0, 0.0).astype(jnp.bfloat16)
        d_oh = jnp.where(cols == di_ref[...], 1.0, 0.0).astype(jnp.bfloat16)
        hs = jnp.dot(s_oh, hf, preferred_element_type=jnp.float32)
        hd = jnp.dot(d_oh, hf, preferred_element_type=jnp.float32)
        z = (hs * hd).astype(jnp.bfloat16)
        h1 = jnp.maximum(
            jnp.dot(z, pw_ref[0], preferred_element_type=jnp.float32)
            + pb_ref[0], 0.0)
        h2 = jnp.maximum(
            jnp.dot(h1.astype(jnp.bfloat16), pw_ref[1],
                    preferred_element_type=jnp.float32) + pb_ref[1], 0.0)
        score_ref[...] = (jnp.dot(h2.astype(jnp.bfloat16), pw_ref[2],
                                  preferred_element_type=jnp.float32)
                          + pb_ref[2])


# ---------------------------------------------------------------------------
# Wrapper: pads/stacks operands, builds the grid, runs one pallas_call.
# ---------------------------------------------------------------------------
def sage_forward(blocks, x, params, pos_edges, neg_edges, *, tile_m=256):
    n_layers = len(blocks)
    dst_counts = [int(b.shape[0]) for b in blocks]
    src_counts = [int(b.shape[1]) for b in blocks]
    f_dims = [x.shape[1]] + [int(w.shape[1]) for w in params["w_self"]]
    f_pad = _round_up(max(f_dims), LANE)

    max_dst = max(dst_counts)
    tm = _round_up(min(tile_m, _round_up(max_dst, SUBLANE)), SUBLANE)
    d_pad = _round_up(max_dst, tm)
    n_tiles = d_pad // tm
    s_pad = _round_up(max(max(src_counts), d_pad), LANE)

    # Stacked, zero-padded per-layer operands.  Padded lanes/rows MUST stay
    # zero (bias/BN-shift padding is zero) so they never leak into real lanes.
    a_st = jnp.zeros((n_layers, d_pad, s_pad), jnp.float32)
    ws_st = jnp.zeros((n_layers, f_pad, f_pad), jnp.float32)
    wn_st = jnp.zeros((n_layers, f_pad, f_pad), jnp.float32)
    b_st = jnp.zeros((n_layers, 1, f_pad), jnp.float32)
    for l in range(n_layers):
        ws, wn, b = params["w_self"][l], params["w_neigh"][l], params["bias"][l]
        fin, fout = ws.shape
        if l != n_layers - 1:
            s = params["bn_scale"][l]
            t = params["bn_shift"][l]
            ws, wn, b = ws * s, wn * s, b * s + t     # fold eval BatchNorm1d
        a_st = a_st.at[l, :dst_counts[l], :src_counts[l]].set(blocks[l])
        ws_st = ws_st.at[l, :fin, :fout].set(ws)
        wn_st = wn_st.at[l, :fin, :fout].set(wn)
        b_st = b_st.at[l, :, :fout].set(b)

    x_pad = jnp.zeros((s_pad, f_pad), jnp.bfloat16)
    x_pad = x_pad.at[:x.shape[0], :x.shape[1]].set(x.astype(jnp.bfloat16))

    pw_st = jnp.zeros((3, f_pad, f_pad), jnp.float32)
    pb_st = jnp.zeros((3, 1, f_pad), jnp.float32)
    for j, (w, b) in enumerate(zip(params["pred_w"], params["pred_b"])):
        pw_st = pw_st.at[j, :w.shape[0], :w.shape[1]].set(w)
        pb_st = pb_st.at[j, :, :w.shape[1]].set(b)

    (p_src, p_dst), (n_src, n_dst) = pos_edges, neg_edges
    n_pos, n_neg = int(p_src.shape[0]), int(n_src.shape[0])
    e_tot = n_pos + n_neg
    e_pad = _round_up(e_tot, SUBLANE)
    src_idx = jnp.zeros((e_pad, 1), jnp.int32).at[:e_tot, 0].set(
        jnp.concatenate([p_src, n_src]).astype(jnp.int32))
    dst_idx = jnp.zeros((e_pad, 1), jnp.int32).at[:e_tot, 0].set(
        jnp.concatenate([p_dst, n_dst]).astype(jnp.int32))

    kernel = functools.partial(_sage_fused_kernel, tile_m=tm, d_pad=d_pad)

    grid_spec = pltpu.PrefetchScalarGridSpec(
        num_scalar_prefetch=0,
        grid=(n_layers, n_tiles),
        in_specs=[
            pl.BlockSpec((s_pad, f_pad), lambda l, i: (0, 0)),        # x
            pl.BlockSpec((1, tm, s_pad), lambda l, i: (l, i, 0)),     # A tile
            pl.BlockSpec((1, f_pad, f_pad), lambda l, i: (l, 0, 0)),  # W_self
            pl.BlockSpec((1, f_pad, f_pad), lambda l, i: (l, 0, 0)),  # W_neigh
            pl.BlockSpec((1, 1, f_pad), lambda l, i: (l, 0, 0)),      # bias
            pl.BlockSpec((3, f_pad, f_pad), lambda l, i: (0, 0, 0)),  # pred W
            pl.BlockSpec((3, 1, f_pad), lambda l, i: (0, 0, 0)),      # pred b
            pl.BlockSpec((e_pad, 1), lambda l, i: (0, 0)),            # src ids
            pl.BlockSpec((e_pad, 1), lambda l, i: (0, 0)),            # dst ids
        ],
        out_specs=[
            pl.BlockSpec((tm, f_pad), lambda l, i: (i, 0)),           # h  bf16
            pl.BlockSpec((e_pad, f_pad), lambda l, i: (0, 0)),        # scores
        ],
        scratch_shapes=[
            pltpu.VMEM((s_pad, f_pad), jnp.bfloat16),   # resident layer input
            pltpu.VMEM((d_pad, f_pad), jnp.bfloat16),   # current layer output
        ],
    )

    h_pad, scores = pl.pallas_call(
        kernel,
        out_shape=(jax.ShapeDtypeStruct((d_pad, f_pad), jnp.bfloat16),
                   jax.ShapeDtypeStruct((e_pad, f_pad), jnp.float32)),
        grid_spec=grid_spec,
        compiler_params=pltpu.CompilerParams(
            # layer axis carries the h dependency; row tiles share the resident
            # h scratch, so both axes are sequential ("arbitrary").
            dimension_semantics=("arbitrary", "arbitrary"),
            vmem_limit_bytes=32 * 1024 * 1024,
        ),
    )(x_pad, a_st.astype(jnp.bfloat16), ws_st.astype(jnp.bfloat16),
      wn_st.astype(jnp.bfloat16), b_st, pw_st.astype(jnp.bfloat16), pb_st,
      src_idx, dst_idx)

    h = h_pad[:dst_counts[-1], :f_dims[-1]].astype(jnp.float32)
    s = scores[:e_tot, :params["pred_w"][-1].shape[1]]
    return h, s[:n_pos], s[n_pos:]


# ---------------------------------------------------------------------------
# Pure-JAX f32 reference (unfolded BN, separate matmuls) for validation.
# ---------------------------------------------------------------------------
def sage_forward_ref(blocks, x, params, pos_edges, neg_edges):
    h = x
    n_layers = len(blocks)
    for l in range(n_layers):
        nd = blocks[l].shape[0]
        neigh = blocks[l] @ h
        out = (h[:nd] @ params["w_self"][l] + neigh @ params["w_neigh"][l]
               + params["bias"][l])
        if l != n_layers - 1:
            out = out * params["bn_scale"][l] + params["bn_shift"][l]
            out = jnp.maximum(out, 0.0)
        h = out

    def mlp(z):
        z = jnp.maximum(z @ params["pred_w"][0] + params["pred_b"][0], 0.0)
        z = jnp.maximum(z @ params["pred_w"][1] + params["pred_b"][1], 0.0)
        return z @ params["pred_w"][2] + params["pred_b"][2]

    (p_src, p_dst), (n_src, n_dst) = pos_edges, neg_edges
    return h, mlp(h[p_src] * h[p_dst]), mlp(h[n_src] * h[n_dst])


# ---------------------------------------------------------------------------
# Deterministic synthetic setup
# ---------------------------------------------------------------------------
def make_block(key, n_dst, n_src):
    """Dense row-normalized mean-aggregation matrix with self-loops."""
    adj = (jax.random.uniform(key, (n_dst, n_src)) < 0.3).astype(jnp.float32)
    adj = adj.at[jnp.arange(n_dst), jnp.arange(n_dst)].set(1.0)
    deg = jnp.sum(adj, axis=1, keepdims=True)
    return adj / deg


def make_params(key, in_feats, n_hidden, n_layers, eps=1e-5):
    params = {"w_self": [], "w_neigh": [], "bias": [],
              "bn_scale": [], "bn_shift": [], "pred_w": [], "pred_b": []}
    dims = [in_feats] + [n_hidden] * n_layers
    for l in range(n_layers):
        key, k1, k2, k3, k4, k5, k6, k7 = jax.random.split(key, 8)
        fin, fout = dims[l], dims[l + 1]
        scale = 1.0 / jnp.sqrt(jnp.float32(fin))
        params["w_self"].append(jax.random.normal(k1, (fin, fout)) * scale)
        params["w_neigh"].append(jax.random.normal(k2, (fin, fout)) * scale)
        params["bias"].append(jax.random.normal(k3, (1, fout)) * 0.1)
        # BatchNorm1d (eval): gamma/beta/running stats as scale/shift
        gamma = 1.0 + 0.1 * jax.random.normal(k4, (1, fout))
        beta = 0.1 * jax.random.normal(k5, (1, fout))
        run_mean = 0.1 * jax.random.normal(k6, (1, fout))
        run_var = 1.0 + 0.1 * jax.random.uniform(k7, (1, fout))
        s = gamma / jnp.sqrt(run_var + eps)
        t = beta - run_mean * s
        params["bn_scale"].append(s.astype(jnp.float32))
        params["bn_shift"].append(t.astype(jnp.float32))
    pred_dims = [n_hidden, n_hidden, n_hidden, 1]
    for l in range(3):
        key, k1, k2 = jax.random.split(key, 3)
        fin, fout = pred_dims[l], pred_dims[l + 1]
        scale = 1.0 / jnp.sqrt(jnp.float32(fin))
        params["pred_w"].append(jax.random.normal(k1, (fin, fout)) * scale)
        params["pred_b"].append(jax.random.normal(k2, (1, fout)) * 0.1)
    return params


if __name__ == "__main__":
    in_feats, n_hidden, n_layers = 16, 32, 3
    node_counts = [64, 32, 16, 8]       # src fan-in per hop; 8 final dst nodes
    n_edges = 16

    key = jax.random.PRNGKey(0)
    key, kx = jax.random.split(key)
    x = jax.random.normal(kx, (node_counts[0], in_feats), dtype=jnp.float32)

    blocks = []
    for l in range(n_layers):
        key, kb = jax.random.split(key)
        blocks.append(make_block(kb, node_counts[l + 1], node_counts[l]))

    key, kp = jax.random.split(key)
    params = make_params(kp, in_feats, n_hidden, n_layers)

    key, k1, k2, k3, k4 = jax.random.split(key, 5)
    nf = node_counts[-1]
    pos_edges = (jax.random.randint(k1, (n_edges,), 0, nf),
                 jax.random.randint(k2, (n_edges,), 0, nf))
    neg_edges = (jax.random.randint(k3, (n_edges,), 0, nf),
                 jax.random.randint(k4, (n_edges,), 0, nf))

    # tile_m=16 -> 2 dst-row tiles per layer: exercises the streamed-A grid.
    h, h_pos, h_neg = sage_forward(blocks, x, params, pos_edges, neg_edges,
                                   tile_m=16)
    h, h_pos, h_neg = jax.block_until_ready((h, h_pos, h_neg))

    assert h.shape == (nf, n_hidden)
    assert h_pos.shape == (n_edges, 1) and h_neg.shape == (n_edges, 1)
    assert bool(jnp.all(jnp.isfinite(h)))
    assert bool(jnp.all(jnp.isfinite(h_pos))) and bool(jnp.all(jnp.isfinite(h_neg)))

    # validate BN-folding + split-dot projection + fused predictor against an
    # f32 reference (generous tolerance: bf16 MXU operands, f32 accumulate)
    h_r, p_r, n_r = sage_forward_ref(blocks, x, params, pos_edges, neg_edges)
    assert bool(jnp.allclose(h, h_r, rtol=1e-1, atol=1e-1))
    assert bool(jnp.allclose(h_pos, p_r, rtol=1e-1, atol=1e-1))
    assert bool(jnp.allclose(h_neg, n_r, rtol=1e-1, atol=1e-1))

    print("KERNEL_OK")
</pallas_src>

<mosaic_0001>
module attributes {stable_mosaic.version = 11 : i64} {
  func.func @_sage_fused_kernel(%arg0: i32, %arg1: i32, %arg2: memref<128x128xbf16, #tpu.memory_space<vmem>>, %arg3: memref<1x16x128xbf16, #tpu.memory_space<vmem>>, %arg4: memref<1x128x128xbf16, #tpu.memory_space<vmem>>, %arg5: memref<1x128x128xbf16, #tpu.memory_space<vmem>>, %arg6: memref<1x1x128xf32, #tpu.memory_space<vmem>>, %arg7: memref<3x128x128xbf16, #tpu.memory_space<vmem>>, %arg8: memref<3x1x128xf32, #tpu.memory_space<vmem>>, %arg9: memref<32x1xi32, #tpu.memory_space<vmem>>, %arg10: memref<32x1xi32, #tpu.memory_space<vmem>>, %arg11: memref<16x128xbf16, #tpu.memory_space<vmem>>, %arg12: memref<32x128xf32, #tpu.memory_space<vmem>>, %arg13: memref<128x128xbf16, #tpu.memory_space<vmem>>, %arg14: memref<32x128xbf16, #tpu.memory_space<vmem>>) attributes {dimension_semantics = [#tpu.dimension_semantics<arbitrary>, #tpu.dimension_semantics<arbitrary>], iteration_bounds = array<i64: 3, 2>, scalar_prefetch = 0 : i64, scratch_operands = 2 : i64, tpu.core_type = #tpu.core_type<tc>, window_params = [{pipeline_mode = #tpu.pipeline_mode<synchronous>, transform_indices = @transform_0, window_bounds = array<i64: 128, 128>}, {transform_indices = @transform_1, window_bounds = array<i64: 1, 16, 128>}, {transform_indices = @transform_2, window_bounds = array<i64: 1, 128, 128>}, {transform_indices = @transform_3, window_bounds = array<i64: 1, 128, 128>}, {transform_indices = @transform_4, window_bounds = array<i64: 1, 1, 128>}, {pipeline_mode = #tpu.pipeline_mode<synchronous>, transform_indices = @transform_5, window_bounds = array<i64: 3, 128, 128>}, {pipeline_mode = #tpu.pipeline_mode<synchronous>, transform_indices = @transform_6, window_bounds = array<i64: 3, 1, 128>}, {pipeline_mode = #tpu.pipeline_mode<synchronous>, transform_indices = @transform_7, window_bounds = array<i64: 32, 1>}, {pipeline_mode = #tpu.pipeline_mode<synchronous>, transform_indices = @transform_8, window_bounds = array<i64: 32, 1>}, {transform_indices = @transform_9, window_bounds = array<i64: 16, 128>}, {pipeline_mode = #tpu.pipeline_mode<synchronous>, transform_indices = @transform_10, window_bounds = array<i64: 32, 128>}]} {
    %c0_i32 = arith.constant 0 : i32
    %0 = arith.cmpi eq, %arg0, %c0_i32 : i32
    %c0_i32_0 = arith.constant 0 : i32
    %1 = arith.cmpi eq, %arg1, %c0_i32_0 : i32
    %2 = arith.andi %0, %1 : i1
    %3 = arith.extui %2 : i1 to i32
    %c0_i32_1 = arith.constant 0 : i32
    %4 = arith.cmpi ne, %3, %c0_i32_1 : i32
    scf.if %4 {
      %c0_24 = arith.constant 0 : index
      %c0_25 = arith.constant 0 : index
      %41 = vector.load %arg2[%c0_24, %c0_25] : memref<128x128xbf16, #tpu.memory_space<vmem>>, vector<128x128xbf16>
      %c0_26 = arith.constant 0 : index
      %c0_27 = arith.constant 0 : index
      %42 = vector.load %arg13[%c0_26, %c0_27] : memref<128x128xbf16, #tpu.memory_space<vmem>>, vector<128x128xbf16>
      tpu.vector_store %arg13[%c0_26, %c0_27], %41 {strides = array<i32>} : memref<128x128xbf16, #tpu.memory_space<vmem>>, vector<128x128xbf16>,
    } else {
    }
    %c16_i32 = arith.constant 16 : i32
    %5 = arith.muli %arg1, %c16_i32 : i32
    %6 = tpu.assume_multiple %5, 16 : i32
    %c0 = arith.constant 0 : index
    %c0_2 = arith.constant 0 : index
    %c0_3 = arith.constant 0 : index
    %7 = vector.load %arg3[%c0, %c0_2, %c0_3] : memref<1x16x128xbf16, #tpu.memory_space<vmem>>, vector<1x16x128xbf16>
    %8 = vector.shape_cast %7 : vector<1x16x128xbf16> to vector<16x128xbf16>
    %c0_4 = arith.constant 0 : index
    %c0_5 = arith.constant 0 : index
    %9 = vector.load %arg13[%c0_4, %c0_5] : memref<128x128xbf16, #tpu.memory_space<vmem>>, vector<128x128xbf16>
    %10 = arith.index_cast %6 : i32 to index
    %c0_6 = arith.constant 0 : index
    %11 = vector.load %arg13[%10, %c0_6] : memref<128x128xbf16, #tpu.memory_space<vmem>>, vector<16x128xbf16>
    %cst = arith.constant dense<0.000000e+00> : vector<16x128xf32>
    %12 = tpu.matmul %8, %9, %cst {dimension_numbers = #tpu.dot_dimension_numbers<[1], [0], [0], [1], [0, 0, 1, 1], [], []>} : vector<16x128xbf16>, vector<128x128xbf16>, vector<16x128xf32> -> vector<16x128xf32>
    %c0_7 = arith.constant 0 : index
    %c0_8 = arith.constant 0 : index
    %c0_9 = arith.constant 0 : index
    %13 = vector.load %arg4[%c0_7, %c0_8, %c0_9] : memref<1x128x128xbf16, #tpu.memory_space<vmem>>, vector<1x128x128xbf16>
    %14 = vector.shape_cast %13 : vector<1x128x128xbf16> to vector<128x128xbf16>
    %cst_10 = arith.constant dense<0.000000e+00> : vector<16x128xf32>
    %15 = tpu.matmul %11, %14, %cst_10 {dimension_numbers = #tpu.dot_dimension_numbers<[1], [0], [0], [1], [0, 0, 1, 1], [], []>} : vector<16x128xbf16>, vector<128x128xbf16>, vector<16x128xf32> -> vector<16x128xf32>
    %16 = arith.truncf %12 : vector<16x128xf32> to vector<16x128xbf16>
    %c0_11 = arith.constant 0 : index
    %c0_12 = arith.constant 0 : index
    %c0_13 = arith.constant 0 : index
    %17 = vector.load %arg5[%c0_11, %c0_12, %c0_13] : memref<1x128x128xbf16, #tpu.memory_space<vmem>>, vector<1x128x128xbf16>
    %18 = vector.shape_cast %17 : vector<1x128x128xbf16> to vector<128x128xbf16>
    %cst_14 = arith.constant dense<0.000000e+00> : vector<16x128xf32>
    %19 = tpu.matmul %16, %18, %cst_14 {dimension_numbers = #tpu.dot_dimension_numbers<[1], [0], [0], [1], [0, 0, 1, 1], [], []>} : vector<16x128xbf16>, vector<128x128xbf16>, vector<16x128xf32> -> vector<16x128xf32>
    %20 = arith.addf %15, %19 : vector<16x128xf32>
    %c0_15 = arith.constant 0 : index
    %c0_16 = arith.constant 0 : index
    %c0_17 = arith.constant 0 : index
    %21 = vector.load %arg6[%c0_15, %c0_16, %c0_17] : memref<1x1x128xf32, #tpu.memory_space<vmem>>, vector<1x1x128xf32>
    %22 = vector.shape_cast %21 : vector<1x1x128xf32> to vector<1x128xf32>
    %23 = vector.broadcast %22 : vector<1x128xf32> to vector<16x128xf32>
    %24 = arith.addf %20, %23 : vector<16x128xf32>
    %c2_i32 = arith.constant 2 : i32
    %25 = arith.cmpi eq, %arg0, %c2_i32 : i32
    %cst_18 = arith.constant 0.000000e+00 : f32
    %26 = vector.broadcast %cst_18 : f32 to vector<16x128xf32>
    %27 = arith.maximumf %24, %26 : vector<16x128xf32>
    %28 = arith.select %25, %24, %27 : vector<16x128xf32>
    %29 = arith.truncf %28 : vector<16x128xf32> to vector<16x128xbf16>
    %30 = arith.index_cast %6 : i32 to index
    %c0_19 = arith.constant 0 : index
    %31 = vector.load %arg14[%30, %c0_19] : memref<32x128xbf16, #tpu.memory_space<vmem>>, vector<16x128xbf16>
    tpu.vector_store %arg14[%30, %c0_19], %29 {strides = array<i32>} : memref<32x128xbf16, #tpu.memory_space<vmem>>, vector<16x128xbf16>,
    %c0_20 = arith.constant 0 : index
    %c0_21 = arith.constant 0 : index
    %32 = vector.load %arg11[%c0_20, %c0_21] : memref<16x128xbf16, #tpu.memory_space<vmem>>, vector<16x128xbf16>
    tpu.vector_store %arg11[%c0_20, %c0_21], %29 {strides = array<i32>} : memref<16x128xbf16, #tpu.memory_space<vmem>>, vector<16x128xbf16>,
    %c1_i32 = arith.constant 1 : i32
    %33 = arith.cmpi eq, %arg1, %c1_i32 : i32
    %true = arith.constant true
    %34 = arith.xori %25, %true : i1
    %35 = arith.andi %33, %34 : i1
    %36 = arith.extui %35 : i1 to i32
    %c0_i32_22 = arith.constant 0 : i32
    %37 = arith.cmpi ne, %36, %c0_i32_22 : i32
    scf.if %37 {
      %c0_24 = arith.constant 0 : index
      %c0_25 = arith.constant 0 : index
      %41 = vector.load %arg14[%c0_24, %c0_25] : memref<32x128xbf16, #tpu.memory_space<vmem>>, vector<32x128xbf16>
      %c0_26 = arith.constant 0 : index
      %c0_27 = arith.constant 0 : index
      %42 = vector.load %arg13[%c0_26, %c0_27] : memref<128x128xbf16, #tpu.memory_space<vmem>>, vector<32x128xbf16>
      tpu.vector_store %arg13[%c0_26, %c0_27], %41 {strides = array<i32>} : memref<128x128xbf16, #tpu.memory_space<vmem>>, vector<32x128xbf16>,
    } else {
    }
    %38 = arith.andi %33, %25 : i1
    %39 = arith.extui %38 : i1 to i32
    %c0_i32_23 = arith.constant 0 : i32
    %40 = arith.cmpi ne, %39, %c0_i32_23 : i32
    scf.if %40 {
      %c0_24 = arith.constant 0 : index
      %c0_25 = arith.constant 0 : index
      %41 = vector.load %arg14[%c0_24, %c0_25] : memref<32x128xbf16, #tpu.memory_space<vmem>>, vector<32x128xbf16>
      %42 = tpu.iota {dimensions = array<i32: 1>} : vector<32x32xi32>
      %c0_26 = arith.constant 0 : index
      %c0_27 = arith.constant 0 : index
      %43 = vector.load %arg9[%c0_26, %c0_27] : memref<32x1xi32, #tpu.memory_space<vmem>>, vector<32x1xi32>
      %44 = vector.broadcast %43 : vector<32x1xi32> to vector<32x32xi32>
      %45 = arith.cmpi eq, %42, %44 : vector<32x32xi32>
      %cst_28 = arith.constant 1.000000e+00 : f32
      %cst_29 = arith.constant 0.000000e+00 : f32
      %46 = vector.broadcast %cst_28 : f32 to vector<32x32xf32>
      %47 = vector.broadcast %cst_29 : f32 to vector<32x32xf32>
      %48 = arith.select %45, %46, %47 : vector<32x32xi1>, vector<32x32xf32>
      %49 = arith.truncf %48 : vector<32x32xf32> to vector<32x32xbf16>
      %c0_30 = arith.constant 0 : index
      %c0_31 = arith.constant 0 : index
      %50 = vector.load %arg10[%c0_30, %c0_31] : memref<32x1xi32, #tpu.memory_space<vmem>>, vector<32x1xi32>
      %51 = vector.broadcast %50 : vector<32x1xi32> to vector<32x32xi32>
      %52 = arith.cmpi eq, %42, %51 : vector<32x32xi32>
      %cst_32 = arith.constant 1.000000e+00 : f32
      %cst_33 = arith.constant 0.000000e+00 : f32
      %53 = vector.broadcast %cst_32 : f32 to vector<32x32xf32>
      %54 = vector.broadcast %cst_33 : f32 to vector<32x32xf32>
      %55 = arith.select %52, %53, %54 : vector<32x32xi1>, vector<32x32xf32>
      %56 = arith.truncf %55 : vector<32x32xf32> to vector<32x32xbf16>
      %cst_34 = arith.constant dense<0.000000e+00> : vector<32x128xf32>
      %57 = tpu.matmul %49, %41, %cst_34 {dimension_numbers = #tpu.dot_dimension_numbers<[1], [0], [0], [1], [0, 0, 1, 1], [], []>} : vector<32x32xbf16>, vector<32x128xbf16>, vector<32x128xf32> -> vector<32x128xf32>
      %cst_35 = arith.constant dense<0.000000e+00> : vector<32x128xf32>
      %58 = tpu.matmul %56, %41, %cst_35 {dimension_numbers = #tpu.dot_dimension_numbers<[1], [0], [0], [1], [0, 0, 1, 1], [], []>} : vector<32x32xbf16>, vector<32x128xbf16>, vector<32x128xf32> -> vector<32x128xf32>
      %59 = arith.mulf %57, %58 : vector<32x128xf32>
      %60 = arith.truncf %59 : vector<32x128xf32> to vector<32x128xbf16>
      %c0_36 = arith.constant 0 : index
      %c0_37 = arith.constant 0 : index
      %c0_38 = arith.constant 0 : index
      %61 = vector.load %arg7[%c0_36, %c0_37, %c0_38] : memref<3x128x128xbf16, #tpu.memory_space<vmem>>, vector<1x128x128xbf16>
      %62 = vector.shape_cast %61 : vector<1x128x128xbf16> to vector<128x128xbf16>
      %cst_39 = arith.constant dense<0.000000e+00> : vector<32x128xf32>
      %63 = tpu.matmul %60, %62, %cst_39 {dimension_numbers = #tpu.dot_dimension_numbers<[1], [0], [0], [1], [0, 0, 1, 1], [], []>} : vector<32x128xbf16>, vector<128x128xbf16>, vector<32x128xf32> -> vector<32x128xf32>
      %c0_40 = arith.constant 0 : index
      %c0_41 = arith.constant 0 : index
      %c0_42 = arith.constant 0 : index
      %64 = vector.load %arg8[%c0_40, %c0_41, %c0_42] : memref<3x1x128xf32, #tpu.memory_space<vmem>>, vector<1x1x128xf32>
      %65 = vector.shape_cast %64 : vector<1x1x128xf32> to vector<1x128xf32>
      %66 = vector.broadcast %65 : vector<1x128xf32> to vector<32x128xf32>
      %67 = arith.addf %63, %66 : vector<32x128xf32>
      %cst_43 = arith.constant 0.000000e+00 : f32
      %68 = vector.broadcast %cst_43 : f32 to vector<32x128xf32>
      %69 = arith.maximumf %67, %68 : vector<32x128xf32>
      %70 = arith.truncf %69 : vector<32x128xf32> to vector<32x128xbf16>
      %c1 = arith.constant 1 : index
      %c0_44 = arith.constant 0 : index
      %c0_45 = arith.constant 0 : index
      %71 = vector.load %arg7[%c1, %c0_44, %c0_45] : memref<3x128x128xbf16, #tpu.memory_space<vmem>>, vector<1x128x128xbf16>
      %72 = vector.shape_cast %71 : vector<1x128x128xbf16> to vector<128x128xbf16>
      %cst_46 = arith.constant dense<0.000000e+00> : vector<32x128xf32>
      %73 = tpu.matmul %70, %72, %cst_46 {dimension_numbers = #tpu.dot_dimension_numbers<[1], [0], [0], [1], [0, 0, 1, 1], [], []>} : vector<32x128xbf16>, vector<128x128xbf16>, vector<32x128xf32> -> vector<32x128xf32>
      %c1_47 = arith.constant 1 : index
      %c0_48 = arith.constant 0 : index
      %c0_49 = arith.constant 0 : index
      %74 = vector.load %arg8[%c1_47, %c0_48, %c0_49] : memref<3x1x128xf32, #tpu.memory_space<vmem>>, vector<1x1x128xf32>
      %75 = vector.shape_cast %74 : vector<1x1x128xf32> to vector<1x128xf32>
      %76 = vector.broadcast %75 : vector<1x128xf32> to vector<32x128xf32>
      %77 = arith.addf %73, %76 : vector<32x128xf32>
      %cst_50 = arith.constant 0.000000e+00 : f32
      %78 = vector.broadcast %cst_50 : f32 to vector<32x128xf32>
      %79 = arith.maximumf %77, %78 : vector<32x128xf32>
      %80 = arith.truncf %79 : vector<32x128xf32> to vector<32x128xbf16>
      %c2 = arith.constant 2 : index
      %c0_51 = arith.constant 0 : index
      %c0_52 = arith.constant 0 : index
      %81 = vector.load %arg7[%c2, %c0_51, %c0_52] : memref<3x128x128xbf16, #tpu.memory_space<vmem>>, vector<1x128x128xbf16>
      %82 = vector.shape_cast %81 : vector<1x128x128xbf16> to vector<128x128xbf16>
      %cst_53 = arith.constant dense<0.000000e+00> : vector<32x128xf32>
      %83 = tpu.matmul %80, %82, %cst_53 {dimension_numbers = #tpu.dot_dimension_numbers<[1], [0], [0], [1], [0, 0, 1, 1], [], []>} : vector<32x128xbf16>, vector<128x128xbf16>, vector<32x128xf32> -> vector<32x128xf32>
      %c2_54 = arith.constant 2 : index
      %c0_55 = arith.constant 0 : index
      %c0_56 = arith.constant 0 : index
      %84 = vector.load %arg8[%c2_54, %c0_55, %c0_56] : memref<3x1x128xf32, #tpu.memory_space<vmem>>, vector<1x1x128xf32>
      %85 = vector.shape_cast %84 : vector<1x1x128xf32> to vector<1x128xf32>
      %86 = vector.broadcast %85 : vector<1x128xf32> to vector<32x128xf32>
      %87 = arith.addf %83, %86 : vector<32x128xf32>
      %c0_57 = arith.constant 0 : index
      %c0_58 = arith.constant 0 : index
      %88 = vector.load %arg12[%c0_57, %c0_58] : memref<32x128xf32, #tpu.memory_space<vmem>>, vector<32x128xf32>
      tpu.vector_store %arg12[%c0_57, %c0_58], %87 {strides = array<i32>} : memref<32x128xf32, #tpu.memory_space<vmem>>, vector<32x128xf32>,
    } else {
    }
    return
  }
  func.func @transform_0(%arg0: i32, %arg1: i32) -> (i32, i32) {
    %c0_i32 = arith.constant 0 : i32
    %c0_i32_0 = arith.constant 0 : i32
    %c0_i32_1 = arith.constant 0 : i32
    return %c0_i32, %c0_i32_0 : i32, i32
  }
  func.func @transform_1(%arg0: i32, %arg1: i32) -> (i32, i32, i32) {
    %c0_i32 = arith.constant 0 : i32
    %c0_i32_0 = arith.constant 0 : i32
    return %arg0, %arg1, %c0_i32 : i32, i32, i32
  }
  func.func @transform_2(%arg0: i32, %arg1: i32) -> (i32, i32, i32) {
    %c0_i32 = arith.constant 0 : i32
    %c0_i32_0 = arith.constant 0 : i32
    %c0_i32_1 = arith.constant 0 : i32
    return %arg0, %c0_i32, %c0_i32_0 : i32, i32, i32
  }
  func.func @transform_3(%arg0: i32, %arg1: i32) -> (i32, i32, i32) {
    %c0_i32 = arith.constant 0 : i32
    %c0_i32_0 = arith.constant 0 : i32
    %c0_i32_1 = arith.constant 0 : i32
    return %arg0, %c0_i32, %c0_i32_0 : i32, i32, i32
  }
  func.func @transform_4(%arg0: i32, %arg1: i32) -> (i32, i32, i32) {
    %c0_i32 = arith.constant 0 : i32
    %c0_i32_0 = arith.constant 0 : i32
    %c0_i32_1 = arith.constant 0 : i32
    return %arg0, %c0_i32, %c0_i32_0 : i32, i32, i32
  }
  func.func @transform_5(%arg0: i32, %arg1: i32) -> (i32, i32, i32) {
    %c0_i32 = arith.constant 0 : i32
    %c0_i32_0 = arith.constant 0 : i32
    %c0_i32_1 = arith.constant 0 : i32
    %c0_i32_2 = arith.constant 0 : i32
    return %c0_i32, %c0_i32_0, %c0_i32_1 : i32, i32, i32
  }
  func.func @transform_6(%arg0: i32, %arg1: i32) -> (i32, i32, i32) {
    %c0_i32 = arith.constant 0 : i32
    %c0_i32_0 = arith.constant 0 : i32
    %c0_i32_1 = arith.constant 0 : i32
    %c0_i32_2 = arith.constant 0 : i32
    return %c0_i32, %c0_i32_0, %c0_i32_1 : i32, i32, i32
  }
  func.func @transform_7(%arg0: i32, %arg1: i32) -> (i32, i32) {
    %c0_i32 = arith.constant 0 : i32
    %c0_i32_0 = arith.constant 0 : i32
    %c0_i32_1 = arith.constant 0 : i32
    return %c0_i32, %c0_i32_0 : i32, i32
  }
  func.func @transform_8(%arg0: i32, %arg1: i32) -> (i32, i32) {
    %c0_i32 = arith.constant 0 : i32
    %c0_i32_0 = arith.constant 0 : i32
    %c0_i32_1 = arith.constant 0 : i32
    return %c0_i32, %c0_i32_0 : i32, i32
  }
  func.func @transform_9(%arg0: i32, %arg1: i32) -> (i32, i32) {
    %c0_i32 = arith.constant 0 : i32
    %c0_i32_0 = arith.constant 0 : i32
    return %arg1, %c0_i32 : i32, i32
  }
  func.func @transform_10(%arg0: i32, %arg1: i32) -> (i32, i32) {
    %c0_i32 = arith.constant 0 : i32
    %c0_i32_0 = arith.constant 0 : i32
    %c0_i32_1 = arith.constant 0 : i32
    return %c0_i32, %c0_i32_0 : i32, i32
  }
}

</mosaic_0001>

<bundles_post_ra>
// kernel: tpu_custom_call.1
= control target key start
LH: loop header
LB: loop body
LE: loop exit
PB: predicated region body
PF: predicated region fallthrough
CT: control target
= control target key end

     0   :  { %s2824_s0 = inlined_call_operand.vmem [shape: bf16[128,128], index: 0, kind: input, shape index: {}]   ;;  %s2825_s1 = inlined_call_operand.hbm [shape: bf16[3,32,128], index: 1, kind: input, shape index: {}]   ;;  %s2826_s2 = inlined_call_operand.hbm [shape: bf16[3,128,128], index: 2, kind: input, shape index: {}]   ;;  %s2827_s3 = inlined_call_operand.hbm [shape: bf16[3,128,128], index: 3, kind: input, shape index: {}]   ;;  %s2828_s4 = inlined_call_operand.hbm [shape: f32[3,1,128], index: 4, kind: input, shape index: {}]   ;;  %s2829_s5 = inlined_call_operand.hbm [shape: bf16[3,128,128], index: 5, kind: input, shape index: {}]   ;;  %s2830_s6 = inlined_call_operand.vmem [shape: f32[3,1,128], index: 6, kind: input, shape index: {}]   ;;  %s2831_s7 = inlined_call_operand.vmem [shape: s32[32,1], index: 7, kind: input, shape index: {}]   ;;  %s2832_s8 = inlined_call_operand.vmem [shape: s32[32,1], index: 8, kind: input, shape index: {}]   ;;  %s2833_s9 = inlined_call_operand.hbm [shape: bf16[32,128], index: 9, kind: output, shape index: {0}]   ;;  %s2834_s10 = inlined_call_operand.hbm [shape: f32[32,128], index: 10, kind: output, shape index: {1}]  }
   0x1   :  { %2861 = sst [smem:[#allocation36_spill]] %s2824_s0 }
   0x2   :  { %2862 = sst [smem:[#allocation37_spill]] %s2826_s2 }
   0x3   :  { %2863 = sst [smem:[#allocation38_spill]] %s2827_s3 }
   0x4   :  { %2864 = sst [smem:[#allocation39_spill]] %s2829_s5 }
   0x5   :  { %2865 = sst [smem:[#allocation40_spill]] %s2830_s6 }
   0x6   :  { %2866 = sst [smem:[#allocation41_spill]] %s2831_s7 }
   0x7   :  { %2867 = sst [smem:[#allocation42_spill]] %s2832_s8 }
   0x8   :  { %2868 = sst [smem:[#allocation43_spill]] %s2833_s9 }
   0x9   :  { %2869 = sst [smem:[#allocation44_spill]] %s2834_s10 }
   0xa   :  { %16 = vsyncpa [#allocation5], 0 }
   0xb   :  { %18 = vsyncpa [#allocation5 + $0x1], 0 }
   0xc   :  { %19 = vsyncpa [#allocation8], 0 }
   0xd   :  { %21 = vsyncpa [#allocation8 + $0x1], 0 }
   0xe   :  { %22 = vsyncpa [#allocation11], 0 }
   0xf   :  { %24 = vsyncpa [#allocation11 + $0x1], 0 }
  0x10   :  { %25 = vsyncpa [#allocation6], 0 }
  0x11   :  { %27 = vsyncpa [#allocation6 + $0x1], 0 }
  0x12   :  { %28 = vsyncpa [#allocation15], 0  ;;  %s2375_s13 = smov 0   ;;  %s2377_s14 = smov 0  }
  0x13   :  { %s2379_s15 = smov 0   ;;  %s2381_s16 = smov 0  }
  0x14   :  { %s2383_s17 = smov 0   ;;  %s2385_s18 = smov 0  }
  0x15   :  { %s2387_s19 = smov 0   ;;  %s2389_s20 = smov 0  }
  0x16   :  { %s2391_s21 = smov 0   ;;  %s2393_s22 = smov 0  }
  0x17   :  { %s2395_s23 = smov 0   ;;  %s2397_s24 = smov 0  }
  0x18   :  { %s2399_s25 = smov 0   ;;  %s2401_s26 = smov 0  }
  0x19 LB: > { %2870 = sst [smem:[#allocation22_spill]] %s2256_s13  ;;  %s2446_s27 = sadd.s32 4294967295, %s2308_s26   ;;  %s2308_s26 = sphi %s2401_s26, %s34_s26   ;;  %s2304_s25 = sphi %s2399_s25, %s2946_s25   ;;  %s2300_s24 = sphi %s2397_s24, %s2945_s24   ;;  %s2296_s23 = sphi %s2395_s23, %s2944_s23   ;;  %s2292_s22 = sphi %s2393_s22, %s2943_s22   ;;  %s2288_s21 = sphi %s2391_s21, %s2933_s21   ;;  %s2284_s20 = sphi %s2389_s20, %s2942_s20   ;;  %s2280_s19 = sphi %s2387_s19, %s2941_s19   ;;  %s2276_s18 = sphi %s2385_s18, %s2940_s18   ;;  %s2272_s17 = sphi %s2383_s17, %s2939_s17   ;;  %s2268_s16 = sphi %s2381_s16, %s2930_s16   ;;  %s2264_s15 = sphi %s2379_s15, %s2929_s15   ;;  %s2260_s14 = sphi %s2377_s14, %s2938_s14   ;;  %s2256_s13 = sphi %s2375_s13, %s2937_s13  }
  0x1a   : > { %2871 = sst [smem:[#allocation23_spill]] %s2264_s15  ;;  %p1478_p0 = scmp.ge.s32.totalorder %s2308_s26, 1 }
  0x1b   : > { %2872 = sst [smem:[#allocation24_spill]] %s2272_s17  ;;  %p90_p1 = scmp.eq.s32.totalorder %s2446_s27, 0 }
  0x1c   : > { %2873 = sst [smem:[#allocation25_spill]] %s2288_s21  ;;  %p275_p2 = scmp.eq.s32.totalorder %s2446_s27, 5 }
  0x1d   : > { %2874 = sst [smem:[#allocation26_spill]] %s2292_s22  ;;  %p309_p3 = scmp.lt.s32.totalorder %s2308_s26, 7 }
  0x1e   : > { %2875 = sst [smem:[#allocation27_spill]] %s2296_s23  ;;  %s2310_s12 = smov [#allocation12]  }
  0x1f   : > { %s2876_s5 = sld [smem:[#allocation39_spill]]  ;;  %p2455_p4 = pnand %p1478_p0, %p309_p3 }
  0x20   : > { %s325_s10 = sshll.u32 %s2310_s12, 4  ;;  %s2839_s28 = smov 64   ;;  %s326_s10 = int_to_ptr.vmem [resolvable:$true] %s325_s10 }
  0x21   : > { %p1812_p5 = pneg %p2455_p4  ;;  %s2841_s29 = smov 4  }
  0x22   : > { %p84_p7 = scmp.eq.s32.totalorder %s2308_s26, 0  ;;  %p109_p8 = scmp.ne.s32.totalorder %s2276_s18, %s2272_s17 }
  0x23   : > { %p1813_p6 = pnand %p1812_p5, %p90_p1  ;;  %p115_p9 = scmp.ne.s32.totalorder %s2272_s17, %s2268_s16 }
  0x24   : > { %p2850_p10 = scmp.lt.s32.totalorder %s2308_s26, 6  ;;  %p111_p11 = por %p109_p8, %p84_p7 }
  0x25   : > { %s323_s30 = sshll.u32 %s2876_s5, 4  ;;  %p2478_p12 = por %p115_p9, %p90_p1  ;;  %s324_s30 = int_to_ptr.hbm [resolvable:$true] %s323_s30 }
  0x26   : > { %1815 = dma.hbm_to_vmem [thread:$0]  (!%p1813_p6), %s324_s30, 3072, %s326_s10, [#allocation11], %s2839_s28, %s2839_s28, %s2841_s29  }
  0x27   : > { %s2878_s9 = scalar_select %p2478_p12, 1, 0 }
  0x28   : > { %s2843_s6 = sand.u32 1, %s2276_s18   ;;  %s1721_s8 = sshll.u32 %s2304_s25, 6 }
  0x29   : > { %2879 = sst [smem:[#allocation28_spill]] %s2878_s9  ;;  %s1485_s7 = sshll.u32 %s2843_s6, 6 }
  0x2a   : > { %s2880_s2 = sld [smem:[#allocation37_spill]]  ;;  %s376_s28 = scalar_lea.vmem [#allocation7], %s1485_s7 }
  0x2b   : > { %s384_s29 = sshll.u32 %s376_s28, 4  ;;  %p2491_p13 = pnand %p2850_p10, %p111_p11  ;;  %s385_s29 = int_to_ptr.vmem [resolvable:$true] %s384_s29 }
  0x2c   : > { %s2882_s3 = sld [smem:[#allocation38_spill]]  ;;  %s2885_s23 = smov 4  }
  0x2d   : > { %s2886_s9 = smov 64   ;;  %s1477_s0 = sadd.s32 4294967294, %s2308_s26  }
  0x2e   : > { %s43_s6 = sadd.s32 1, %s2300_s24  ;;  %p83_p3 = scmp.ne.s32.totalorder %s2288_s21, %s2284_s20 }
  0x2f   : > { %p44_p0 = scmp.ge.s32.totalorder %s43_s6, 2  ;;  %p89_p8 = scmp.ne.s32.totalorder %s2284_s20, %s2280_s19 }
  0x30   : > { %s381_s5 = scalar_lea.hbm %s2880_s2, %s1721_s8  ;;  %s2884_s2 = sand.u32 1, %s2308_s26  }
  0x31   : > { %s382_s16 = sshll.u32 %s381_s5, 4  ;;  %s398_s5 = scalar_lea.vmem [#allocation9], %s1485_s7  ;;  %s383_s16 = int_to_ptr.hbm [resolvable:$true] %s382_s16 }
  0x32   : > { %s403_s10 = scalar_lea.hbm %s2882_s3, %s1721_s8  ;;  %s2498_s28 = sshll.u32 %s398_s5, 4 }
  0x33   : > { %2883 = sst [smem:[#allocation29_spill]] %s2498_s28  ;;  %s404_s30 = sshll.u32 %s403_s10, 4  ;;  %s2510_s30 = int_to_ptr.hbm [resolvable:$true] %s404_s30 }
  0x34   : > { %s2502_s22 = scalar_lea.sflag [#allocation8], %s2884_s2  ;;  %s46_s2 = sadd.s32 1, %s2304_s25 }
  0x35   : > { %1822 = dma.hbm_to_vmem [thread:$0]  (!%p2491_p13), %s383_s16, 1024, %s385_s29, %s2502_s22, %s2886_s9, %s2886_s9, %s2885_s23  }
  0x36   : > { %s76_s7 = sadd.s32 1, %s2288_s21  ;;  %s2948_s6 = smov (%p44_p0, %s43_s6), 0 }
  0x37   : > { %2887 = sst [smem:[#allocation30_spill]] %s2948_s6  ;;  %s2950_s2 = smov (!%p44_p0, %s46_s2), %s2304_s25 }
  0x38   : > { %s72_s8 = ssub.s32 %s2300_s24, %s2948_s6  ;;  %p2526_p5 = por %p84_p7, %p83_p3 }
  0x39   : > { %p48_p6 = scmp.ge.s32.totalorder %s2950_s2, 3  ;;  %p262_p9 = scmp.eq.s32.totalorder %s72_s8, 0 }
  0x3a   : > { %s264_s16 = sadd.s32 1, %s2264_s15  ;;  %p2537_p11 = por %p90_p1, %p89_p8 }
  0x3b   : > { %s2952_s2 = smov (%p48_p6, %s2950_s2), 0  ;;  %p274_p7 = scmp.ne.s32.totalorder %s2264_s15, %s2260_s14 }
  0x3c   : > { %2889 = sst [smem:[#allocation31_spill]] %s2952_s2  ;;  %s71_s5 = ssub.s32 %s2304_s25, %s2952_s2 }
  0x3d   : > { %s2890_s10 = scalar_select %p2537_p11, 1, 0 }
  0x3e   : > { %p280_p0 = scmp.ne.s32.totalorder %s2260_s14, %s2256_s13  ;;  %s73_s28 = sor.u32 %s72_s8, %s71_s5 }
  0x3f   : > { %2891 = sst [smem:[#allocation32_spill]] %s2890_s10  ;;  %p100_p3 = scmp.eq.s32.totalorder %s71_s5, 0 }
  0x40   : > { %p74_p10 = scmp.eq.s32.totalorder %s73_s28, 0  ;;  %p2549_p12 = por %p275_p2, %p274_p7 }
  0x41   : > { %s2893_s3 = sadd.s32 1, %s2276_s18  ;;  %p281_p6 = scmp.eq.s32.totalorder %s1477_s0, 5 }
  0x42   : > { %s2556_s6 = scalar_select %p100_p3, %s2276_s18, %s2893_s3  }
  0x43   : > { %s2559_s17 = scalar_select %p74_p10, %s2288_s21, %s76_s7  }
  0x44   : > { %2894 = sst [smem:[#allocation33_spill]] %s2556_s6  ;;  %s348_s2 = sand.u32 1, %s2288_s21  }
  0x45   : > { %2895 = sst [smem:[#allocation34_spill]] %s2559_s17  ;;  %s1481_s28 = sshll.u32 %s348_s2, 3 }
  0x46   : > { %s2562_s10 = scalar_select %p262_p9, %s2264_s15, %s264_s16  }
  0x47   : > { %s2897_s8 = sld [smem:[#allocation29_spill]]  ;;  %p2565_p8 = por %p281_p6, %p280_p0 }
  0x48   : > { %2896 = sst [smem:[#allocation35_spill]] %s2562_s10  ;;  %s1482_s13 = sshll.u32 %s2300_s24, 1 }
  0x49   : > { %s2898_s5 = scalar_select %p2565_p8, 1, 0 }
  0x4a   : > { %s1483_s3 = sshll.u32 %s2304_s25, 2  ;;  %s352_s7 = scalar_lea.vmem [#allocation4], %s1481_s28 }
  0x4b   : > { %2899 = sst [smem:[#allocation29_spill]] %s2898_s5  ;;  %s357_s6 = sadd.s32 %s1483_s3, %s1482_s13 }
  0x4c   : > { %s362_s17 = sshll.u32 %s352_s7, 4  ;;  %s1484_s16 = sshll.u32 %s357_s6, 2  ;;  %s363_s17 = int_to_ptr.vmem [resolvable:$true] %s362_s17 }
  0x4d   : > { %s359_s10 = scalar_lea.hbm %s2825_s1, %s1484_s16  ;;  %p2900_p10 = scmp.lt.s32.totalorder %s2308_s26, 6 }
  0x4e   : > { %s360_s15 = sshll.u32 %s359_s10, 4  ;;  %s349_s5 = scalar_lea.sflag [#allocation5], %s348_s2  ;;  %s361_s15 = int_to_ptr.hbm [resolvable:$true] %s360_s15 }
  0x4f   : > { %p1817_p9 = pnand %p2900_p10, %p2526_p5  ;;  %s2901_s13 = int_to_ptr.vmem [resolvable:$true] %s2897_s8 }
  0x50   : > { %1825 = dma.hbm_to_vmem [thread:$0]  (!%p2491_p13), %s2510_s30, 1024, %s2901_s13, %s2502_s22, %s2886_s9, %s2886_s9, %s2885_s23  }
  0x51   : > { %1819 = dma.hbm_to_vmem [thread:$0]  (!%p1817_p9), %s361_s15, 128, %s363_s17, %s349_s5, %s2886_s9, %s2886_s9, %s2885_s23  }
  0x52   : > { %s422_s21 = scalar_lea.hbm %s2828_s4, %s2304_s25  ;;  %s2902_s3 = sand.u32 1, %s2276_s18  }
  0x53   : > { %s424_s29 = sshll.u32 %s422_s21, 4  ;;  %s419_s7 = scalar_lea.vmem [#allocation10], %s2902_s3  ;;  %s425_s29 = int_to_ptr.hbm [resolvable:$true] %s424_s29 }
  0x54   : > { %s426_s10 = sshll.u32 %s419_s7, 4  ;;  %s2903_s2 = sand.u32 1, %s2308_s26   ;;  %s427_s10 = int_to_ptr.vmem [resolvable:$true] %s426_s10 }
  0x55   : > { %s417_s16 = scalar_lea.sflag [#allocation11], %s2903_s2  ;;  %435 = sbr.rel (%p2455_p4) target bundleno = 1209 (0x4b9), region = 56 }
  0x56   : > { %1828 = dma.hbm_to_vmem [thread:$0]  (!%p2491_p13), %s425_s29, 16, %s427_s10, %s417_s16  }
  0x57   : > { %s437_s9 = sand.u32 (!%p2455_p4), 1, %s2284_s20  }
  0x58   : > { %s2603_s17 = sshll.u32 (!%p2455_p4), %s437_s9, 3  ;;  %s438_s22 = scalar_lea.sflag (!%p2455_p4), [#allocation5], %s437_s9 }
  0x59   : > { %s441_s23 = scalar_lea.vmem (!%p2455_p4), [#allocation4], %s2603_s17 }
  0x5a   : > { %2231 = dma.done.wait (%p2537_p11), %s438_s22, 128  }
  0x5b   : > { %2233 = vsyncadd (%p2537_p11), %s438_s22, 4294967168  ;;  %s2905_s30 = sld [smem:[#allocation24_spill]]  ;;  %s447_s8 = sand.u32 1, %s2446_s27  }
  0x5c   : > { %s2906_s12 = sld [smem:[#allocation28_spill]]  ;;  %s448_s0 = scalar_lea.sflag [#allocation8], %s447_s8 }
  0x61   : > { %s449_s5 = sand.u32 1, %s2905_s30  }
  0x62   : > { %s1493_s11 = sshll.u32 %s449_s5, 6  ;;  %p2907_p4 = scmp.ne.s32.totalorder %s2906_s12, 0 }
  0x63   : > { %s2612_s13 = scalar_lea.vmem [#allocation7], %s1493_s11 }
  0x64   : > { %2235 = dma.done.wait (%p2907_p4), %s448_s0, 2048  }
  0x65   : > { %2237 = vsyncadd (%p2907_p4), %s448_s0, 4294965248  ;;  %s2618_s6 = scalar_lea.vmem [#allocation9], %s1493_s11  ;;  %s468_s28 = scalar_lea.sflag [#allocation11], %s447_s8 }
  0x66   : > { %s2620_s21 = scalar_lea.vmem [#allocation10], %s449_s5 }
  0x67   : > { %2239 = dma.done.wait (%p2907_p4), %s468_s28, 16  }
  0x68   : > { %2241 = vsyncadd (%p2907_p4), %s468_s28, 4294967280 }
  0x69   : > { %2243 = dma.done.wait (%p90_p1), [#allocation11], 3072  }
  0x6a   : > { %2245 = vsyncadd (%p90_p1), [#allocation11], 4294964224  ;;  %s2908_s29 = sld [smem:[#allocation27_spill]]  ;;  %s522_s7 = sand.u32 1, %s2260_s14  }
  0x6b   : > { %s2909_s3 = sld [smem:[#allocation26_spill]]  ;;  %s2634_s10 = sshll.u32 %s522_s7, 3 }
  0x6c   : > { %s524_s2 = scalar_lea.vmem [#allocation13], %s2634_s10 }
  0x70   : > { %p530_p13 = scmp.eq.s32.totalorder %s2908_s29, 0 }
  0x71   : > { %p531_p5 = scmp.eq.s32.totalorder %s2909_s3, 0 }
  0x73   : > { %p532_p11 = pnand %p531_p5, %p530_p13 }
  0x74   : > { %s2910_s9 = sld [smem:[#allocation36_spill]] (!%p532_p11) }
  0x75   : > { %535 = sbr.rel (%p532_p11) target bundleno = 131 (0x83), region = 80 }
  0x7a   : > { %v536_v0 = vld [vmem:[%s2910_s9] sm:$0xff]   ;;  %v538_v1 = vld [vmem:[%s2910_s9 + $0x8] sm:$0xff]   ;;  %v540_v2 = vld [vmem:[%s2910_s9 + $0x10] sm:$0xff]  }
  0x7b   : > { %552 = vst [vmem:[#allocation2] sm:$0xff] %v536_v0   ;;  %v542_v3 = vld [vmem:[%s2910_s9 + $0x18] sm:$0xff]   ;;  %v544_v4 = vld [vmem:[%s2910_s9 + $0x20] sm:$0xff]   ;;  %v546_v5 = vld [vmem:[%s2910_s9 + $0x28] sm:$0xff]  }
  0x7c   : > { %554 = vst [vmem:[#allocation2 + $0x8] sm:$0xff] %v538_v1   ;;  %v548_v6 = vld [vmem:[%s2910_s9 + $0x30] sm:$0xff]   ;;  %v550_v7 = vld [vmem:[%s2910_s9 + $0x38] sm:$0xff]  }
  0x7d   : > { %556 = vst [vmem:[#allocation2 + $0x10] sm:$0xff] %v540_v2  }
  0x7e   : > { %558 = vst [vmem:[#allocation2 + $0x18] sm:$0xff] %v542_v3  }
  0x7f   : > { %560 = vst [vmem:[#allocation2 + $0x20] sm:$0xff] %v544_v4  }
  0x80   : > { %562 = vst [vmem:[#allocation2 + $0x28] sm:$0xff] %v546_v5  }
  0x81   : > { %564 = vst [vmem:[#allocation2 + $0x30] sm:$0xff] %v548_v6  }
  0x82   : > { %566 = vst [vmem:[#allocation2 + $0x38] sm:$0xff] %v550_v7  }
  0x83 PF: > { %v1740_v10 = vld [vmem:[%s2612_s13 + $0x38] sm:$0xff]  ;;  %v1739_v12 = vld [vmem:[%s2612_s13 + $0x30] sm:$0xff]  ;;  %v1738_v15 = vld [vmem:[%s2612_s13 + $0x28] sm:$0xff]  ;;  %s2911_s12 = sld [smem:[#allocation26_spill]] }
  0x84   : > { %v1748_v11 = vld [vmem:[%s2618_s6 + $0x38] sm:$0xff]  ;;  %810 = vmatpush.bf16.msra.mxu2 %v1740_v10  ;;  %v1747_v14 = vld [vmem:[%s2618_s6 + $0x30] sm:$0xff]  ;;  %v1746_v17 = vld [vmem:[%s2618_s6 + $0x28] sm:$0xff]  ;;  %s2912_s28 = sld [smem:[#allocation27_spill]] }
  0x85   : > { %742 = vmatpush.bf16.msra.mxu1 %v1748_v11  ;;  %v1737_v18 = vld [vmem:[%s2612_s13 + $0x20] sm:$0xff]  ;;  %v1727_v19 = vld [vmem:[#allocation2 + $0x18] sm:$0xff]  ;;  %v1726_v22 = vld [vmem:[#allocation2 + $0x10] sm:$0xff] }
  0x86   : > { %v1728_v16 = vld [vmem:[#allocation2 + $0x20] sm:$0xff]  ;;  %v1736_v21 = vld [vmem:[%s2612_s13 + $0x18] sm:$0xff]  ;;  %v1735_v24 = vld [vmem:[%s2612_s13 + $0x10] sm:$0xff] }
  0x87   : > { %v1729_v13 = vld [vmem:[#allocation2 + $0x28] sm:$0xff]  ;;  %v1745_v20 = vld [vmem:[%s2618_s6 + $0x20] sm:$0xff]  ;;  %v1744_v23 = vld [vmem:[%s2618_s6 + $0x18] sm:$0xff] }
  0x88   : > { %v1730_v9 = vld [vmem:[#allocation2 + $0x30] sm:$0xff]  ;;  %811 = vmatpush.bf16.msra.mxu2 %v1739_v12  ;;  %v1725_v25 = vld [vmem:[#allocation2 + $0x8] sm:$0xff]  ;;  %v1724_v27 = vld [vmem:[#allocation2] sm:$0xff] }
  0x89   : > { %v1731_v8 = vld [vmem:[#allocation2 + $0x38] sm:$0xff]  ;;  %743 = vmatpush.bf16.msra.mxu1 %v1747_v14  ;;  %s1497_s8 = sshll.u32 %s2911_s12, 4  ;;  %v1734_v26 = vld [vmem:[%s2612_s13 + $0x8] sm:$0xff]  ;;  %v1733_v29 = vld [vmem:[%s2612_s13] sm:$0xff]  ;;  %p846_p1 = scmp.eq.s32.totalorder %s2911_s12, 1 }
  0x8a   : > { %647 = vmatpush.bf16.msra.mxu0 %v1731_v8  ;;  %s2674_s5 = sshra.s32 %s1497_s8, 3  ;;  %v1723_v28 = vld [vmem:[%s441_s23] sm:$0xff]  ;;  %v1742_v32 = vld [vmem:[%s2618_s6 + $0x8] sm:$0xff]  ;;  %v1741_v33 = vld [vmem:[%s2618_s6] sm:$0xff]  ;;  %p847_p7 = scmp.ne.s32.totalorder %s2912_s28, 2 }
  0x8b   : > { %s1498_s11 = sshll.u32 %s2674_s5, 2  ;;  %v1743_v31 = vld [vmem:[%s2618_s6 + $0x10] sm:$0xff]  ;;  %p830_p3 = scmp.eq.s32.totalorder %s2912_s28, 2  ;;  %v1961_v40 = vld [vmem:[%s2620_s21] ss:$0 sm:$0xff] }
  0x8c   : > { %812 = vmatpush.bf16.msra.mxu2 %v1738_v15  ;;  %s590_s0 = scalar_lea.vmem [#allocation2], %s1498_s11  ;;  %p2690_p0 = pnand %p847_p7, %p846_p1 }
  0x8d   : > { %744 = vmatpush.bf16.msra.mxu1 %v1746_v17  ;;  %v1732_v30 = vld [vmem:[%s590_s0] sm:$0xff]  ;;  %s833_s23 = scalar_select %p830_p3, 1, 0 }
  0x8e   : > { %648 = vmatpush.bf16.msra.mxu0 %v1730_v9  ;;  %s841_s13 = scalar_lea.vmem [#allocation3], %s1498_s11 }
  0x8f   : > { %v834_v44 = vstv %s833_s23 }
  0x90   : > { %813 = vmatpush.bf16.msra.mxu2 %v1737_v18  ;;  %vm835_vm0 = vcmp.eq.s32.totalorder %v834_v44, 1 }
  0x91   : > { %745 = vmatpush.bf16.msra.mxu1 %v1745_v20 }
  0x92   : > { %649 = vmatpush.bf16.msra.mxu0 %v1729_v13 }
  0x94   : > { %814 = vmatpush.bf16.msra.mxu2 %v1736_v21 }
  0x95   : > { %746 = vmatpush.bf16.msra.mxu1 %v1744_v23 }
  0x96   : > { %650 = vmatpush.bf16.msra.mxu0 %v1728_v16 }
  0x98   : > { %815 = vmatpush.bf16.msra.mxu2 %v1735_v24 }
  0x99   : > { %747 = vmatpush.bf16.msra.mxu1 %v1743_v31 }
  0x9a   : > { %651 = vmatpush.bf16.msra.mxu0 %v1727_v19 }
  0x9c   : > { %816 = vmatpush.bf16.msra.mxu2 %v1734_v26 }
  0x9d   : > { %748 = vmatpush.bf16.msra.mxu1 %v1742_v32 }
  0x9e   : > { %652 = vmatpush.bf16.msra.mxu0 %v1726_v22 }
  0xa0   : > { %817 = vmatpush.bf16.msra.mxu2 %v1733_v29 }
  0xa1   : > { %749 = vmatpush.bf16.msra.mxu1 %v1741_v33 }
  0xa2   : > { %653 = vmatpush.bf16.msra.mxu0 %v1725_v25 }
  0xa3   : > { %818 = vmatmul.bf16.vlgmr.msra.gmra.mxu2 %v1732_v30 }
  0xa6   : > { %654 = vmatpush.bf16.msra.mxu0 %v1724_v27 }
  0xa9   : > { %655 = vmatmul.bf16.vlgmr.msra.gmra.mxu0 %v1723_v28 }
 0x126   : > { %v656_v34 = vpop.f32.mrf.mxu0  ;;  %v819_v37 = vpop.f32.mrf.mxu2 }
 0x12e   : > { %v658_v35 = vpop.f32.mrf.mxu0  ;;  %v821_v42 = vpop.f32.mrf.mxu2 }
 0x12f   : > { %v677_v36 = vpack.c.bf16 %v658_v35, %v656_v34 }
 0x131   : > { %750 = vmatmul.bf16.vlgmr.msra.gmra.mxu1 %v677_v36 }
 0x1ae   : > { %v751_v38 = vpop.f32.mrf.mxu1 }
 0x1af   : > { %v820_v39 = vadd.f32 %v819_v37, %v751_v38 }
 0x1b1   : > { %v828_v41 = vadd.f32 %v1961_v40, %v820_v39 }
 0x1b3   : > { %v831_v46 = vmax.f32 %v828_v41, 0.0 }
 0x1b5   : > { %v836_v49 = vsel %vm835_vm0, %v828_v41, %v831_v46 }
 0x1b6   : > { %v753_v43 = vpop.f32.mrf.mxu1 }
 0x1b7   : > { %v822_v45 = vadd.f32 %v821_v42, %v753_v43 }
 0x1b9   : > { %v829_v47 = vadd.f32 %v1961_v40, %v822_v45 }
 0x1bb   : > { %v832_v48 = vmax.f32 %v829_v47, 0.0 }
 0x1bd   : > { %v837_v50 = vsel %vm835_vm0, %v829_v47, %v832_v48  ;;  %851 = sbr.rel (%p2690_p0) target bundleno = 458 (0x1ca), region = 84 }
 0x1be   : > { %v1779_v51 = vpack.c.bf16 %v837_v50, %v836_v49 }
 0x1c0   : > { %1780 = vst [vmem:[%s841_s13] sm:$0xff] %v1779_v51  }
 0x1c1   : > { %1785 = vst [vmem:[%s524_s2] sm:$0xff] %v1779_v51  }
 0x1c7   : > { %v852_v52 = vld [vmem:[#allocation3] sm:$0xff]   ;;  %v854_v53 = vld [vmem:[#allocation3 + $0x8] sm:$0xff]  }
 0x1c8   : > { %856 = vst [vmem:[#allocation2] sm:$0xff] %v852_v52  }
 0x1c9   : > { %858 = vst [vmem:[#allocation2 + $0x8] sm:$0xff] %v854_v53  }
 0x1ca PF: > { %p860_p6 = pnand %p846_p1, %p830_p3 }
 0x1cb   : > { %s2916_s16 = sld [smem:[#allocation42_spill]] (!%p860_p6) }
 0x1cc   : > { %863 = sbr.rel (%p860_p6) target bundleno = 1177 (0x499), region = 88  ;;  %s2918_s12 = sld [smem:[#allocation41_spill]] (!%p860_p6) }
 0x1cd   : > { %s2919_s22 = sld [smem:[#allocation40_spill]] (!%p860_p6) }
 0x1d1   : > { %s2917_s30 = smov %s2916_s16  ;;  %v896_v54 = vld [vmem:[%s2916_s16] sm:$0xff]  ;;  %v2313_v56 = vmov 0   ;;  %v1750_v63 = vld [vmem:[#allocation3 + $0x8] sm:$0xff]  ;;  %v868_v2 = vlaneseq  ;;  %v1757_v3 = vld [vmem:[#allocation12 + $0x30] sm:$0xff]  ;;  %vm934_vm5 = vcmask 261120   ;;  %v2314_v12 = vmov 0.0  }
 0x1d2   : > { %v870_v55 = vld [vmem:[%s2918_s12] sm:$0xff]  ;;  %1963 = vset.pattern.permute.xlu1 %v2313_v56  ;;  %1962 = vset.pattern.permute.xlu0 %v2313_v56  ;;  %v872_v57 = vld [vmem:[%s2918_s12 + $0x10] sm:$0xff]  ;;  %v897_v58 = vld [vmem:[%s2917_s30 + $0x8] sm:$0xff] }
 0x1d3   : > { %901 = vperm.xlu1 %1963, %v896_v54   ;;  %875 = vperm.xlu0 %1962, %v870_v55   ;;  %v871_v59 = vld [vmem:[%s2918_s12 + $0x8] sm:$0xff]  ;;  %v873_v60 = vld [vmem:[%s2918_s12 + $0x18] sm:$0xff]  ;;  %v898_v62 = vld [vmem:[%s2917_s30 + $0x10] sm:$0xff]  ;;  %v869_v6 = vand.u32 127, %v868_v2  ;;  %s2920_s8 = smov %s2919_s22 }
 0x1d4   : > { %1964 = vset.pattern.permute.xlu2 %v2313_v56  ;;  %v899_v61 = vld [vmem:[%s2917_s30 + $0x18] sm:$0xff]  ;;  %947 = vmatpush.bf16.msra.mxu0 %v1750_v63  ;;  %v1749_v0 = vld [vmem:[#allocation3] sm:$0xff]  ;;  %v1756_v7 = vld [vmem:[#allocation12 + $0x28] sm:$0xff] }
 0x1d5   : > { %881 = vperm.xlu2 %1964, %v872_v57   ;;  %972 = vmatpush.bf16.msra.mxu1 %v1750_v63  ;;  %v1758_v1 = vld [vmem:[#allocation12 + $0x38] sm:$0xff]  ;;  %v1755_v9 = vld [vmem:[#allocation12 + $0x20] sm:$0xff]  ;;  %v1753_v29 = vld [vmem:[#allocation12 + $0x10] sm:$0xff] }
 0x1d6   : > { %1059 = vmatpush.bf16.msra.mxu2 %v1758_v1  ;;  %v1754_v19 = vld [vmem:[#allocation12 + $0x18] sm:$0xff]  ;;  %v1752_v30 = vld [vmem:[#allocation12 + $0x8] sm:$0xff]  ;;  %v1751_v31 = vld [vmem:[#allocation12] sm:$0xff] }
 0x1d7   : > { %v1766_v32 = vld [vmem:[#allocation12 + $0x78] sm:$0xff]  ;;  %v1765_v33 = vld [vmem:[#allocation12 + $0x70] sm:$0xff]  ;;  %v1764_v36 = vld [vmem:[#allocation12 + $0x68] sm:$0xff] }
 0x1d8   : > { %948 = vmatpush.bf16.msra.mxu0 %v1749_v0  ;;  %1154 = vmatpush.bf16.msra.mxu3 %v1766_v32  ;;  %v1763_v37 = vld [vmem:[#allocation12 + $0x60] sm:$0xff]  ;;  %v1762_v50 = vld [vmem:[#allocation12 + $0x58] sm:$0xff]  ;;  %v1761_v51 = vld [vmem:[#allocation12 + $0x50] sm:$0xff] }
 0x1d9   : > { %973 = vmatpush.bf16.msra.mxu1 %v1749_v0  ;;  %v1760_v52 = vld [vmem:[#allocation12 + $0x48] sm:$0xff]  ;;  %v1759_v53 = vld [vmem:[#allocation12 + $0x40] sm:$0xff]  ;;  %v1774_v54 = vld [vmem:[#allocation12 + $0xb8] sm:$0xff] }
 0x1da   : > { %1060 = vmatpush.bf16.msra.mxu2 %v1757_v3  ;;  %v1773_v56 = vld [vmem:[#allocation12 + $0xb0] sm:$0xff]  ;;  %v1965_v57 = vld [vmem:[%s2919_s22] ss:$0 sm:$0xff] }
 0x1db   : > { %904 = vperm.xlu1 %1963, %v897_v58   ;;  %878 = vperm.xlu0 %1962, %v871_v59   ;;  %v1772_v58 = vld [vmem:[#allocation12 + $0xa8] sm:$0xff] }
 0x1dc   : > { %1155 = vmatpush.bf16.msra.mxu3 %v1765_v33  ;;  %1249 = vmatpush.bf16.msrb.mxu0 %v1774_v54 }
 0x1dd   : > { %884 = vperm.xlu2 %1964, %v873_v60   ;;  %1786 = vmatpush.bf16.msrb.mxu1 %v1774_v54 }
 0x1de   : > { %1061 = vmatpush.bf16.msra.mxu2 %v1756_v7 }
 0x1e0   : > { %1156 = vmatpush.bf16.msra.mxu3 %v1764_v36  ;;  %1250 = vmatpush.bf16.msrb.mxu0 %v1773_v56 }
 0x1e1   : > { %1787 = vmatpush.bf16.msrb.mxu1 %v1773_v56 }
 0x1e2   : > { %1062 = vmatpush.bf16.msra.mxu2 %v1755_v9  ;;  %v1770_v9 = vld [vmem:[#allocation12 + $0x98] sm:$0xff] }
 0x1e3   : > { %910 = vperm.xlu1 %1963, %v899_v61   ;;  %907 = vperm.xlu0 %1962, %v898_v62   ;;  %v1771_v62 = vld [vmem:[#allocation12 + $0xa0] sm:$0xff] }
 0x1e4   : > { %1157 = vmatpush.bf16.msra.mxu3 %v1763_v37  ;;  %1251 = vmatpush.bf16.msrb.mxu0 %v1772_v58 }
 0x1e5   : > { %1788 = vmatpush.bf16.msrb.mxu1 %v1772_v58 }
 0x1e6   : > { %1063 = vmatpush.bf16.msra.mxu2 %v1754_v19 }
 0x1e8   : > { %1158 = vmatpush.bf16.msra.mxu3 %v1762_v50  ;;  %1252 = vmatpush.bf16.msrb.mxu0 %v1771_v62 }
 0x1e9   : > { %1789 = vmatpush.bf16.msrb.mxu1 %v1771_v62 }
 0x1ea   : > { %1064 = vmatpush.bf16.msra.mxu2 %v1753_v29 }
 0x1ec   : > { %1159 = vmatpush.bf16.msra.mxu3 %v1761_v51  ;;  %1253 = vmatpush.bf16.msrb.mxu0 %v1770_v9 }
 0x1ed   : > { %1790 = vmatpush.bf16.msrb.mxu1 %v1770_v9 }
 0x1ee   : > { %1065 = vmatpush.bf16.msra.mxu2 %v1752_v30 }
 0x1f0   : > { %1160 = vmatpush.bf16.msra.mxu3 %v1760_v52 }
 0x1f2   : > { %1066 = vmatpush.bf16.msra.mxu2 %v1751_v31 }
 0x1f4   : > { %1161 = vmatpush.bf16.msra.mxu3 %v1759_v53 }
 0x22f   : > { %v882_v8 = vpop.permute.xlu2 %881 }
 0x230   : > { %vm888_vm6 = vcmp.eq.s32.totalorder %v869_v6, %v882_v8 }
 0x231   : > { %v892_v23 = vsel %vm888_vm6, 1.0, %v2314_v12 }
 0x237   : > { %v885_v20 = vpop.permute.xlu2 %884 }
 0x238   : > { %vm889_vm8 = vcmp.eq.s32.totalorder %v869_v6, %v885_v20 }
 0x239   : > { %v893_v25 = vsel %vm889_vm8, 1.0, %v2314_v12 }
 0x23a   : > { %v895_v27 = vpack.c.bf16 %v893_v25, %v892_v23 }
 0x245   : > { %v902_v4 = vpop.permute.xlu1 %901  ;;  %v876_v5 = vpop.permute.xlu0 %875 }
 0x246   : > { %vm912_vm1 = vcmp.eq.s32.totalorder %v869_v6, %v902_v4  ;;  %vm886_vm2 = vcmp.eq.s32.totalorder %v869_v6, %v876_v5 }
 0x247   : > { %v916_v13 = vsel %vm912_vm1, 1.0, %v2314_v12  ;;  %v890_v14 = vsel %vm886_vm2, 1.0, %v2314_v12 }
 0x24d   : > { %v905_v10 = vpop.permute.xlu1 %904  ;;  %v879_v11 = vpop.permute.xlu0 %878 }
 0x24e   : > { %vm913_vm3 = vcmp.eq.s32.totalorder %v869_v6, %v905_v10  ;;  %vm887_vm4 = vcmp.eq.s32.totalorder %v869_v6, %v879_v11  ;;  %v1769_v10 = vld [vmem:[#allocation12 + $0x90] sm:$0xff]  ;;  %v1768_v11 = vld [vmem:[#allocation12 + $0x88] sm:$0xff] }
 0x24f   : > { %v917_v15 = vsel %vm913_vm3, 1.0, %v2314_v12  ;;  %v891_v16 = vsel %vm887_vm4, 1.0, %v2314_v12  ;;  %1254 = vmatpush.bf16.msrb.mxu0 %v1769_v10  ;;  %1791 = vmatpush.bf16.msrb.mxu1 %v1769_v10 }
 0x250   : > { %v920_v17 = vpack.c.bf16 %v917_v15, %v916_v13  ;;  %v894_v18 = vpack.c.bf16 %v891_v16, %v890_v14  ;;  %v1966_v14 = vld [vmem:[%s2920_s8 + $0x1] ss:$0 sm:$0xff] }
 0x252   : > { %1612 = vmatmul.msk.bf16.vlgmr.msra.gmra.mxu0 %vm934_vm5, %v894_v18  ;;  %1614 = vmatmul.msk.bf16.vlgmr.msra.gmra.mxu1 %vm934_vm5, %v920_v17 }
 0x253   : > { %1255 = vmatpush.bf16.msrb.mxu0 %v1768_v11  ;;  %1792 = vmatpush.bf16.msrb.mxu1 %v1768_v11 }
 0x255   : > { %v911_v21 = vpop.permute.xlu1 %910  ;;  %v908_v22 = vpop.permute.xlu0 %907 }
 0x256   : > { %vm915_vm7 = vcmp.eq.s32.totalorder %v869_v6, %v911_v21  ;;  %vm914_vm9 = vcmp.eq.s32.totalorder %v869_v6, %v908_v22 }
 0x257   : > { %v919_v24 = vsel %vm915_vm7, 1.0, %v2314_v12  ;;  %v918_v26 = vsel %vm914_vm9, 1.0, %v2314_v12  ;;  %v1767_v12 = vld [vmem:[#allocation12 + $0x80] sm:$0xff] }
 0x258   : > { %v921_v28 = vpack.c.bf16 %v919_v24, %v918_v26  ;;  %1256 = vmatpush.bf16.msrb.mxu0 %v1767_v12  ;;  %1793 = vmatpush.bf16.msrb.mxu1 %v1767_v12 }
 0x262   : > { %1613 = vmatmul.msk.bf16.gmra.mxu0 %vm934_vm5, %v895_v27  ;;  %1615 = vmatmul.msk.bf16.gmra.mxu1 %vm934_vm5, %v921_v28  ;;  %v1967_v28 = vld [vmem:[%s2920_s8 + $0x2] ss:$0 sm:$0xff] }
 0x2cf   : > { %v950_v34 = vpop.f32.mrf.mxu0  ;;  %v975_v35 = vpop.f32.mrf.mxu1 }
 0x2d0   : > { %v985_v40 = vmul.f32 %v975_v35, %v950_v34 }
 0x2d7   : > { %v952_v38 = vpop.f32.mrf.mxu0  ;;  %v977_v39 = vpop.f32.mrf.mxu1 }
 0x2d8   : > { %v986_v41 = vmul.f32 %v977_v39, %v952_v38 }
 0x2da   : > { %v989_v42 = vpack.c.bf16 %v986_v41, %v985_v40 }
 0x2dc   : > { %1067 = vmatmul.bf16.vlgmr.msra.gmra.mxu2 %v989_v42 }
 0x2df   : > { %v955_v43 = vpop.f32.mrf.mxu0  ;;  %v980_v44 = vpop.f32.mrf.mxu1 }
 0x2e0   : > { %v987_v47 = vmul.f32 %v980_v44, %v955_v43 }
 0x2e7   : > { %v957_v45 = vpop.f32.mrf.mxu0  ;;  %v982_v46 = vpop.f32.mrf.mxu1 }
 0x2e8   : > { %v988_v48 = vmul.f32 %v982_v46, %v957_v45 }
 0x2ea   : > { %v990_v49 = vpack.c.bf16 %v988_v48, %v987_v47 }
 0x2ec   : > { %1072 = vmatmul.bf16.gmra.mxu2 %v990_v49 }
 0x35f   : > { %v1068_v55 = vpop.f32.mrf.mxu2 }
 0x360   : > { %v1069_v59 = vadd.f32 %v1965_v57, %v1068_v55 }
 0x362   : > { %v1078_v63 = vmax.f32 %v1069_v59, 0.0 }
 0x367   : > { %v1070_v60 = vpop.f32.mrf.mxu2 }
 0x368   : > { %v1071_v61 = vadd.f32 %v1965_v57, %v1070_v60 }
 0x36a   : > { %v1079_v0 = vmax.f32 %v1071_v61, 0.0 }
 0x36c   : > { %v1082_v1 = vpack.c.bf16 %v1079_v0, %v1078_v63 }
 0x36e   : > { %1162 = vmatmul.bf16.vlgmr.msra.gmra.mxu3 %v1082_v1 }
 0x36f   : > { %v1073_v2 = vpop.f32.mrf.mxu2 }
 0x370   : > { %v1074_v3 = vadd.f32 %v1965_v57, %v1073_v2 }
 0x372   : > { %v1080_v6 = vmax.f32 %v1074_v3, 0.0 }
 0x377   : > { %v1075_v4 = vpop.f32.mrf.mxu2 }
 0x378   : > { %v1076_v5 = vadd.f32 %v1965_v57, %v1075_v4 }
 0x37a   : > { %v1081_v7 = vmax.f32 %v1076_v5, 0.0 }
 0x37c   : > { %v1083_v8 = vpack.c.bf16 %v1081_v7, %v1080_v6 }
 0x37e   : > { %1167 = vmatmul.bf16.gmra.mxu3 %v1083_v8 }
 0x3f1   : > { %v1163_v13 = vpop.f32.mrf.mxu3 }
 0x3f2   : > { %v1164_v15 = vadd.f32 %v1966_v14, %v1163_v13 }
 0x3f4   : > { %v1173_v18 = vmax.f32 %v1164_v15, 0.0 }
 0x3f9   : > { %v1165_v16 = vpop.f32.mrf.mxu3 }
 0x3fa   : > { %v1166_v17 = vadd.f32 %v1966_v14, %v1165_v16 }
 0x3fc   : > { %v1174_v19 = vmax.f32 %v1166_v17, 0.0 }
 0x3fe   : > { %v1177_v20 = vpack.c.bf16 %v1174_v19, %v1173_v18 }
 0x400   : > { %1257 = vmatmul.bf16.vlgmr.msrb.gmra.mxu0 %v1177_v20 }
 0x401   : > { %v1168_v21 = vpop.f32.mrf.mxu3 }
 0x402   : > { %v1169_v22 = vadd.f32 %v1966_v14, %v1168_v21 }
 0x404   : > { %v1175_v25 = vmax.f32 %v1169_v22, 0.0 }
 0x409   : > { %v1170_v23 = vpop.f32.mrf.mxu3 }
 0x40a   : > { %v1171_v24 = vadd.f32 %v1966_v14, %v1170_v23 }
 0x40c   : > { %v1176_v26 = vmax.f32 %v1171_v24, 0.0 }
 0x40e   : > { %v1178_v27 = vpack.c.bf16 %v1176_v26, %v1175_v25 }
 0x410   : > { %1262 = vmatmul.bf16.vlgmr.msrb.gmra.mxu1 %v1178_v27 }
 0x47d   : > { %v1258_v29 = vpop.f32.mrf.mxu0 }
 0x47e   : > { %v1259_v30 = vadd.f32 %v1967_v28, %v1258_v29 }
 0x480   : > { %1268 = vst [vmem:[#allocation14] sm:$0xff] %v1259_v30 }
 0x485   : > { %v1260_v31 = vpop.f32.mrf.mxu0 }
 0x486   : > { %v1261_v32 = vadd.f32 %v1967_v28, %v1260_v31 }
 0x488   : > { %1269 = vst [vmem:[#allocation14 + $0x8] sm:$0xff] %v1261_v32 }
 0x48d   : > { %v1263_v33 = vpop.f32.mrf.mxu1 }
 0x48e   : > { %v1264_v34 = vadd.f32 %v1967_v28, %v1263_v33 }
 0x490   : > { %1270 = vst [vmem:[#allocation14 + $0x10] sm:$0xff] %v1264_v34 }
 0x495   : > { %v1265_v35 = vpop.f32.mrf.mxu1 }
 0x496   : > { %v1266_v36 = vadd.f32 %v1967_v28, %v1265_v35 }
 0x498   : > { %1271 = vst [vmem:[#allocation14 + $0x18] sm:$0xff] %v1266_v36 }
 0x499 PF: > { %s2921_s17 = sld [smem:[#allocation26_spill]]  ;;  %s1285_s16 = sshll.u32 %s524_s2, 4  ;;  %s1286_s16 = int_to_ptr.vmem [resolvable:$true] %s1285_s16 }
 0x49a   : > { %s2922_s21 = sld [smem:[#allocation43_spill]]  ;;  %s1273_s22 = scalar_lea.sflag [#allocation6], %s522_s7 }
 0x49f   : > { %s1775_s23 = sshll.u32 %s2921_s17, 3 }
 0x4a0   : > { %s2923_s29 = smov %s2922_s21  ;;  %s1284_s3 = scalar_lea.hbm %s2922_s21, %s1775_s23 }
 0x4a1   : > { %s1287_s15 = sshll.u32 %s1284_s3, 4  ;;  %s2138_s17 = scalar_lea.hbm %s2923_s29, 16  ;;  %s1288_s15 = int_to_ptr.hbm [resolvable:$true] %s1287_s15 }
 0x4a2   : > { %s2132_s5 = sshra.s32 %s1288_s15, 4  ;;  %s2133_s5 = int_to_ptr.hbm [resolvable:$true] %s2132_s5 }
 0x4a3   : > { %s2134_s11 = scalar_lea.hbm %s2133_s5, 8  ;;  %p2139_p13 = scmp.lt.s32.totalorder %s2133_s5, %s2923_s29 }
 0x4a4   : > { %p2135_p10 = scmp.ne.s32.totalorder %s2133_s5, %s2134_s11  ;;  %p2140_p5 = scmp.lt.s32.totalorder %s2138_s17, %s2134_s11 }
 0x4a6   : > { %p2136_p9 = pnand %p2135_p10, %p2549_p12  ;;  %p2141_p11 = por %p2140_p5, %p2139_p13 }
 0x4a8   : > { %p2137_p4 = pneg %p2136_p9 }
 0x4aa   : > { %p2142_p1 = pnand %p2141_p11, %p2137_p4 }
 0x4ac   : > { %2145 = shalt.err (!%p2142_p1)
}
 0x4ad   : > { %s2315_s7 = smov 64   ;;  %s2316_s10 = smov 4  }
 0x4ae   : > { %1806 = dma.vmem_to_hbm [thread:$0]  (%p2549_p12), %s1286_s16, 128, %s1288_s15, %s1273_s22, %s2315_s7, %s2315_s7, %s2316_s10  }
 0x4af   : > { %s2924_s21 = sld [smem:[#allocation44_spill]]  ;;  %s2317_s0 = smov [#allocation14]  }
 0x4b0   : > { %s1299_s28 = sshll.u32 %s2317_s0, 4  ;;  %s2318_s5 = smov 128   ;;  %s1300_s28 = int_to_ptr.vmem [resolvable:$true] %s1299_s28 }
 0x4b1   : > { %s2319_s11 = smov 8  }
 0x4b5   : > { %s1301_s3 = sshll.u32 %s2924_s21, 4  ;;  %s1302_s3 = int_to_ptr.hbm [resolvable:$true] %s1301_s3 }
 0x4b6   : > { %1808 = dma.vmem_to_hbm [thread:$0]  (%p275_p2), %s1300_s28, 512, %s1302_s3, [#allocation15], %s2318_s5, %s2318_s5, %s2319_s11  }
 0x4b7   : > { %2247 = dma.done.wait (%p275_p2), [#allocation15], 512  }
 0x4b8   : > { %2249 = vsyncadd (%p275_p2), [#allocation15], 4294966784 }
 0x4b9 PF: > { %s2925_s19 = sld [smem:[#allocation22_spill]]  ;;  %p1838_p12 = scmp.ge.s32.totalorder %s2308_s26, 2 }
 0x4bb   : > { %p1830_p7 = pnand %p1838_p12, %p2565_p8 }
 0x4bd   : > { %p1831_p0 = pneg %p1830_p7 }
 0x4bf   : > { %s1321_s15 = sand.u32 1, %s2925_s19  }
 0x4c0   : > { %s1322_s22 = scalar_lea.sflag [#allocation6], %s1321_s15 }
 0x4c1   : > { %2251 = dma.done.wait (%p1831_p0), %s1322_s22, 128  }
 0x4c2   : > { %2253 = vsyncadd (%p1831_p0), %s1322_s22, 4294967168  ;;  %s34_s26 = sadd.s32 1, %s2308_s26   ;;  %s2928_s27 = sld [smem:[#allocation23_spill]] }
 0x4c3   : > { %p2777_p3 = scmp.ge.s32.totalorder %s34_s26, 8   ;;  %s2929_s15 = sld [smem:[#allocation35_spill]] }
 0x4c4   : > { %s2930_s16 = sld [smem:[#allocation24_spill]]  ;;  %s2937_s13 = smov %s2260_s14 }
 0x4c5   : > { %s2931_s23 = sld [smem:[#allocation33_spill]]  ;;  %s2939_s17 = smov %s2276_s18 }
 0x4c6   : > { %s2932_s7 = sld [smem:[#allocation25_spill]]  ;;  %s2941_s19 = smov %s2284_s20 }
 0x4c7   : > { %s2933_s21 = sld [smem:[#allocation34_spill]]  ;;  %s2943_s22 = smov %s2300_s24 }
 0x4c8   : > { %s2934_s10 = sld [smem:[#allocation30_spill]]  ;;  %s2938_s14 = smov %s2928_s27 }
 0x4c9   : > { %s2935_s2 = sld [smem:[#allocation31_spill]] }
 0x4cb   : > { %s2940_s18 = smov %s2931_s23  ;;  %s2944_s23 = smov %s2304_s25 }
 0x4cc   : > { %s2942_s20 = smov %s2932_s7  ;;  %33 = sbr.rel (!%p2777_p3) target bundleno = 25 (0x19), region = 168 }
 0x4ce   : > { %s2945_s24 = smov %s2934_s10 }
 0x4cf   : > { %s2946_s25 = smov %s2935_s2 }
 0x4d1   :  { %1328 = vsyncpa [#allocation5], 1 }
 0x4d2   :  { %1330 = vsyncpa [#allocation5 + $0x1], 1 }
 0x4d3   :  { %1331 = vsyncpa [#allocation8], 1 }
 0x4d4   :  { %1333 = vsyncpa [#allocation8 + $0x1], 1 }
 0x4d5   :  { %1334 = vsyncpa [#allocation11], 1 }
 0x4d6   :  { %1336 = vsyncpa [#allocation11 + $0x1], 1 }
 0x4d7   :  { %1337 = vsyncpa [#allocation6], 1 }
 0x4d8   :  { %1339 = vsyncpa [#allocation6 + $0x1], 1 }
 0x4d9   :  { %1340 = vsyncpa [#allocation15], 1 }

</bundles_post_ra>
